<compile_context>
chip_gen: v5e
topology: v5e:2x2
jax: 0.10.0
libtpu: 0.0.40
codegen_flags: <defaults>
</compile_context>

<pallas_src>
import functools

import numpy as np

import jax
import jax.numpy as jnp
from jax.experimental import pallas as pl
from jax.experimental.pallas import tpu as pltpu


# ----------------------------------------------------------------------------
# Kernels
# ----------------------------------------------------------------------------

def _sa_matmul_kernel(wmat_ref, x_ref, o_ref, *, mul_in_f32):
    # wmat_ref : VMEM (2, HW, HW) f32 masked-Toeplitz conv matrix (padding folded in)
    # x_ref    : VMEM (nb, C, HW) input block (lane-dense flattened spatial axis)
    # o_ref    : VMEM (nb, C, HW) output block
    xv = x_ref[...]
    avg = jnp.mean(xv, axis=1, dtype=jnp.float32)            # (nb, HW) f32 accum
    mx = jnp.max(xv, axis=1).astype(jnp.float32)             # (nb, HW)

    # 2 -> 1 channel KxK conv with zero padding == two MXU matmuls.
    acc = (jnp.dot(avg, wmat_ref[0], preferred_element_type=jnp.float32)
           + jnp.dot(mx, wmat_ref[1], preferred_element_type=jnp.float32))
    att = jax.nn.sigmoid(acc)                                  # (nb, HW), EUP

    # Lane-dense broadcast-multiply + full unmasked stores.
    if mul_in_f32:
        o_ref[...] = (att[:, None, :] * xv.astype(jnp.float32)).astype(o_ref.dtype)
    else:
        o_ref[...] = (att.astype(xv.dtype)[:, None, :] * xv).astype(o_ref.dtype)


def _sa_roll_kernel(wm_ref, x_ref, o_ref, *, Kk, H, W, mul_in_f32):
    # Fallback for large H*W (Toeplitz matrix would not fit VMEM).
    # wm_ref : VMEM (2*Kk*Kk, HW) f32 per-tap weight rows pre-multiplied by the
    #          border-validity mask (== zero padding).
    Pp = Kk // 2
    HW = H * W
    nb = x_ref.shape[0]

    xv = x_ref[...]
    avg = jnp.mean(xv, axis=1, dtype=jnp.float32)             # (nb, HW)
    mx = jnp.max(xv, axis=1).astype(jnp.float32)              # (nb, HW)

    # KxK conv via cyclic lane rolls (XLU) + VPU MACs; zero padding handled by
    # the pre-masked weight rows.  4 independent partial accumulators break the
    # long serial f32 add chain so the 4 VALUs can co-issue.
    n_acc = 4
    accs = [jnp.zeros((nb, HW), jnp.float32) for _ in range(n_acc)]
    for c, m in enumerate((avg, mx)):
        for kh in range(Kk):
            dh = kh - Pp
            m_h = m if dh == 0 else pltpu.roll(m, (-dh * W) % HW, axis=1)
            for kw in range(Kk):
                dw = kw - Pp
                m_hw = m_h if dw == 0 else pltpu.roll(m_h, (-dw) % HW, axis=1)
                tap = (c * Kk + kh) * Kk + kw
                accs[tap % n_acc] = accs[tap % n_acc] + wm_ref[tap] * m_hw
    acc = (accs[0] + accs[1]) + (accs[2] + accs[3])
    att = jax.nn.sigmoid(acc)

    if mul_in_f32:
        o_ref[...] = (att[:, None, :] * xv.astype(jnp.float32)).astype(o_ref.dtype)
    else:
        o_ref[...] = (att.astype(xv.dtype)[:, None, :] * xv).astype(o_ref.dtype)


# ----------------------------------------------------------------------------
# Wrapper-side weight preprocessing
# ----------------------------------------------------------------------------

def _masked_toeplitz_conv_matrix(conv_weight, H, W):
    """(2, HW, HW) f32: Wmat[c, p_in, p_out] = conv weight with which output
    pixel p_out reads input pixel p_in of channel c; taps that would read
    outside the image are dropped (== zero padding)."""
    Kk = int(conv_weight.shape[-1])
    Pp = Kk // 2
    HW = H * W
    w = np.asarray(jax.device_get(conv_weight), np.float32).reshape(2, Kk, Kk)
    mat = np.zeros((2, HW, HW), np.float32)
    ho, wo = np.arange(H), np.arange(W)
    for kh in range(Kk):
        hi = ho + kh - Pp
        hm = (hi >= 0) & (hi < H)
        for kw in range(Kk):
            wi = wo + kw - Pp
            wm = (wi >= 0) & (wi < W)
            in_idx = (hi[hm][:, None] * W + wi[wm][None, :]).ravel()
            out_idx = (ho[hm][:, None] * W + wo[wm][None, :]).ravel()
            for c in range(2):
                mat[c, in_idx, out_idx] += w[c, kh, kw]
    return jnp.asarray(mat)


def _masked_weight_rows(conv_weight, H, W):
    """(2*K*K, H*W) f32: conv weight per tap, zeroed where the tap would read
    outside the image (== zero padding).  Used by the roll fallback."""
    Kk = int(conv_weight.shape[-1])
    Pp = Kk // 2
    HW = H * W
    valid = np.zeros((Kk, Kk, H, W), np.float32)
    for kh in range(Kk):
        dh = kh - Pp
        h_ok = (np.arange(H) + dh >= 0) & (np.arange(H) + dh < H)
        for kw in range(Kk):
            dw = kw - Pp
            w_ok = (np.arange(W) + dw >= 0) & (np.arange(W) + dw < W)
            valid[kh, kw] = np.outer(h_ok, w_ok).astype(np.float32)
    valid = jnp.asarray(valid.reshape(Kk * Kk, HW))                  # (K*K, HW)
    w = conv_weight.reshape(2, Kk * Kk, 1).astype(jnp.float32)       # (2, K*K, 1)
    return (w * valid[None, :, :]).reshape(2 * Kk * Kk, HW)          # (2*K*K, HW)


# ----------------------------------------------------------------------------
# Hardware queries (best effort, safe fallbacks)
# ----------------------------------------------------------------------------

def _vmem_capacity_bytes():
    try:
        return int(pltpu.get_tpu_info().vmem_capacity_bytes)
    except Exception:
        pass
    try:
        kind = jax.devices()[0].device_kind.lower()
        if "v7" in kind:
            return 64 << 20
    except Exception:
        pass
    return 64 << 20  # conservative across all generations


def _is_v5e():
    try:
        kind = jax.devices()[0].device_kind.lower()
        return ("v5 lite" in kind) or ("v5e" in kind) or ("v5litepod" in kind)
    except Exception:
        return False


# ----------------------------------------------------------------------------
# Public wrapper
# ----------------------------------------------------------------------------

def spatial_attention(x, conv_weight, *, target_block_bytes=8 << 20,
                      wmat_max_bytes=8 << 20, force_roll=False):
    """x: (N, C, H, W); conv_weight: (1, 2, K, K) from Conv2d(2, 1, K, bias=False)."""
    N, C, H, W = x.shape
    Kk = int(conv_weight.shape[-1])
    HW = H * W
    itemsize = jnp.dtype(x.dtype).itemsize

    # Lane-dense layout: spatial dims flattened onto the 128-lane axis.
    x_flat = x.reshape(N, C, HW)

    # v5e has no bf16 VALU -> keep the final multiply in f32 there; f32 inputs
    # take this path anyway (the astype is a no-op).
    mul_in_f32 = (jnp.dtype(x.dtype) == jnp.dtype(jnp.float32)) or _is_v5e()

    use_matmul = (not force_roll) and (2 * HW * HW * 4 <= wmat_max_bytes)
    if use_matmul:
        w_arg = _masked_toeplitz_conv_matrix(conv_weight, H, W)          # (2, HW, HW)
        w_spec = pl.BlockSpec((2, HW, HW), lambda b: (0, 0, 0))
        kernel = functools.partial(_sa_matmul_kernel, mul_in_f32=mul_in_f32)
    else:
        w_arg = _masked_weight_rows(conv_weight, H, W)                   # (2*K*K, HW)
        w_spec = pl.BlockSpec((2 * Kk * Kk, HW), lambda b: (0, 0))
        kernel = functools.partial(_sa_roll_kernel, Kk=Kk, H=H, W=W,
                                   mul_in_f32=mul_in_f32)
    w_bytes = 2 * int(w_arg.size) * 4            # double-buffered weight block

    # Generation-aware VMEM budget (leave ~30% headroom for Mosaic scratch).
    budget = int(0.7 * _vmem_capacity_bytes())

    # Conservative live bytes per batch row of a block: double-buffered in+out
    # blocks + one f32 full-row temp + a handful of (HW,) f32 map temps.
    per_elem_bytes = C * HW * itemsize
    per_row_budget = 4 * per_elem_bytes + C * HW * 4 + 10 * HW * 4

    nb = max(1, min(N,
                    max(1, target_block_bytes // per_elem_bytes),
                    max(1, (budget - w_bytes) // per_row_budget)))
    if N >= 2:
        # Keep >= 2 grid steps so the "parallel" batch axis can split across
        # both v7x TensorCores (negligible cost on single-TC v5e/v6e).
        nb = min(nb, max(1, N // 2))
    nb = int(nb)
    grid = (pl.cdiv(N, nb),)

    vmem_limit = int(min(budget,
                         max(32 << 20, w_bytes + nb * per_row_budget + (2 << 20))))

    out_flat = pl.pallas_call(
        kernel,
        out_shape=jax.ShapeDtypeStruct((N, C, HW), x.dtype),
        grid=grid,
        in_specs=[
            w_spec,                                            # grid-invariant weights
            pl.BlockSpec((nb, C, HW), lambda b: (b, 0, 0)),    # x block
        ],
        out_specs=pl.BlockSpec((nb, C, HW), lambda b: (b, 0, 0)),
        compiler_params=pltpu.CompilerParams(
            dimension_semantics=("parallel",),
            vmem_limit_bytes=vmem_limit,
        ),
    )(w_arg, x_flat)
    return out_flat.reshape(N, C, H, W)


# ----------------------------------------------------------------------------
# Self-test
# ----------------------------------------------------------------------------

if __name__ == "__main__":
    K = 7
    key = jax.random.PRNGKey(0)
    kx, kw = jax.random.split(key)

    N, C, H, W = 2, 4, 16, 16
    x = jax.random.normal(kx, (N, C, H, W), dtype=jnp.float32)
    conv_w = 0.1 * jax.random.normal(kw, (1, 2, K, K), dtype=jnp.float32)

    # float64 numpy reference (direct convolution definition, independent of
    # the in-kernel Toeplitz / roll constructions).
    xn = np.asarray(jax.device_get(x), np.float64)
    wn = np.asarray(jax.device_get(conv_w), np.float64)
    P = K // 2
    amap = np.stack([xn.mean(axis=1), xn.max(axis=1)], axis=1)        # (N,2,H,W)
    pad = np.zeros((N, 2, H + 2 * P, W + 2 * P), np.float64)
    pad[:, :, P:P + H, P:P + W] = amap
    conv = np.zeros((N, H, W), np.float64)
    for kh in range(K):
        for kw_ in range(K):
            conv += np.einsum("nchw,c->nhw",
                              pad[:, :, kh:kh + H, kw_:kw_ + W], wn[0, :, kh, kw_])
    ref = (1.0 / (1.0 + np.exp(-conv)))[:, None, :, :] * xn

    # Default (masked-Toeplitz MXU matmul) path.  The f32 MXU matmul at DEFAULT
    # precision may use bf16 passes, so use a matching tolerance here.
    out = jax.block_until_ready(spatial_attention(x, conv_w))
    assert out.shape == (N, C, H, W)
    assert np.allclose(np.asarray(out, np.float64), ref, atol=2e-2, rtol=2e-2), \
        "MXU path mismatch vs reference"

    # Roll/VPU fallback path (exact f32 math) — tight tolerance.
    out_roll = jax.block_until_ready(spatial_attention(x, conv_w, force_roll=True))
    assert np.allclose(np.asarray(out_roll, np.float64), ref, atol=1e-5, rtol=1e-5), \
        "roll path mismatch vs reference"

    print("KERNEL_OK")
</pallas_src>

<mosaic_0001>
module attributes {stable_mosaic.version = 11 : i64} {
  func.func @_sa_matmul_kernel(%arg0: i32, %arg1: memref<2x256x256xf32, #tpu.memory_space<vmem>>, %arg2: memref<1x4x256xf32, #tpu.memory_space<vmem>>, %arg3: memref<1x4x256xf32, #tpu.memory_space<vmem>>) attributes {dimension_semantics = [#tpu.dimension_semantics<parallel>], iteration_bounds = array<i64: 2>, scalar_prefetch = 0 : i64, scratch_operands = 0 : i64, tpu.core_type = #tpu.core_type<tc>, window_params = [{pipeline_mode = #tpu.pipeline_mode<synchronous>, transform_indices = @transform_0, window_bounds = array<i64: 2, 256, 256>}, {transform_indices = @transform_1, window_bounds = array<i64: 1, 4, 256>}, {transform_indices = @transform_2, window_bounds = array<i64: 1, 4, 256>}]} {
    %c0 = arith.constant 0 : index
    %c0_0 = arith.constant 0 : index
    %c0_1 = arith.constant 0 : index
    %0 = vector.load %arg2[%c0, %c0_0, %c0_1] : memref<1x4x256xf32, #tpu.memory_space<vmem>>, vector<1x4x256xf32>
    %cst = arith.constant dense<0.000000e+00> : vector<1x256xf32>
    %1 = vector.multi_reduction <add>, %0, %cst [1] : vector<1x4x256xf32> to vector<1x256xf32>
    %cst_2 = arith.constant 4.000000e+00 : f32
    %2 = vector.broadcast %cst_2 : f32 to vector<1x256xf32>
    %3 = arith.divf %1, %2 : vector<1x256xf32>
    %cst_3 = arith.constant dense<0xFF800000> : vector<1x256xf32>
    %4 = vector.multi_reduction <maximumf>, %0, %cst_3 [1] : vector<1x4x256xf32> to vector<1x256xf32>
    %c0_4 = arith.constant 0 : index
    %c0_5 = arith.constant 0 : index
    %c0_6 = arith.constant 0 : index
    %5 = vector.load %arg1[%c0_4, %c0_5, %c0_6] : memref<2x256x256xf32, #tpu.memory_space<vmem>>, vector<1x256x256xf32>
    %6 = vector.shape_cast %5 : vector<1x256x256xf32> to vector<256x256xf32>
    %cst_7 = arith.constant dense<0.000000e+00> : vector<1x256xf32>
    %7 = tpu.matmul %3, %6, %cst_7 {dimension_numbers = #tpu.dot_dimension_numbers<[1], [0], [0], [1], [0, 0, 1, 1], [], []>} : vector<1x256xf32>, vector<256x256xf32>, vector<1x256xf32> -> vector<1x256xf32>
    %c1 = arith.constant 1 : index
    %c0_8 = arith.constant 0 : index
    %c0_9 = arith.constant 0 : index
    %8 = vector.load %arg1[%c1, %c0_8, %c0_9] : memref<2x256x256xf32, #tpu.memory_space<vmem>>, vector<1x256x256xf32>
    %9 = vector.shape_cast %8 : vector<1x256x256xf32> to vector<256x256xf32>
    %cst_10 = arith.constant dense<0.000000e+00> : vector<1x256xf32>
    %10 = tpu.matmul %4, %9, %cst_10 {dimension_numbers = #tpu.dot_dimension_numbers<[1], [0], [0], [1], [0, 0, 1, 1], [], []>} : vector<1x256xf32>, vector<256x256xf32>, vector<1x256xf32> -> vector<1x256xf32>
    %11 = arith.addf %7, %10 : vector<1x256xf32>
    %12 = arith.negf %11 : vector<1x256xf32>
    %13 = math.exp %12 : vector<1x256xf32>
    %cst_11 = arith.constant 1.000000e+00 : f32
    %14 = vector.broadcast %cst_11 : f32 to vector<1x256xf32>
    %15 = arith.addf %14, %13 : vector<1x256xf32>
    %16 = arith.divf %14, %15 : vector<1x256xf32>
    %17 = vector.shape_cast %16 : vector<1x256xf32> to vector<1x1x256xf32>
    %18 = vector.broadcast %17 : vector<1x1x256xf32> to vector<1x4x256xf32>
    %19 = arith.mulf %18, %0 : vector<1x4x256xf32>
    %c0_12 = arith.constant 0 : index
    %c0_13 = arith.constant 0 : index
    %c0_14 = arith.constant 0 : index
    %20 = vector.load %arg3[%c0_12, %c0_13, %c0_14] : memref<1x4x256xf32, #tpu.memory_space<vmem>>, vector<1x4x256xf32>
    tpu.vector_store %arg3[%c0_12, %c0_13, %c0_14], %19 {strides = array<i32>} : memref<1x4x256xf32, #tpu.memory_space<vmem>>, vector<1x4x256xf32>,
    return
  }
  func.func @transform_0(%arg0: i32) -> (i32, i32, i32) {
    %c0_i32 = arith.constant 0 : i32
    %c0_i32_0 = arith.constant 0 : i32
    %c0_i32_1 = arith.constant 0 : i32
    %c0_i32_2 = arith.constant 0 : i32
    return %c0_i32, %c0_i32_0, %c0_i32_1 : i32, i32, i32
  }
  func.func @transform_1(%arg0: i32) -> (i32, i32, i32) {
    %c0_i32 = arith.constant 0 : i32
    %c0_i32_0 = arith.constant 0 : i32
    %c0_i32_1 = arith.constant 0 : i32
    return %arg0, %c0_i32, %c0_i32_0 : i32, i32, i32
  }
  func.func @transform_2(%arg0: i32) -> (i32, i32, i32) {
    %c0_i32 = arith.constant 0 : i32
    %c0_i32_0 = arith.constant 0 : i32
    %c0_i32_1 = arith.constant 0 : i32
    return %arg0, %c0_i32, %c0_i32_0 : i32, i32, i32
  }
}

</mosaic_0001>

<bundles_post_ra>
// kernel: tpu_custom_call.1
= control target key start
LH: loop header
LB: loop body
LE: loop exit
PB: predicated region body
PF: predicated region fallthrough
CT: control target
= control target key end

     0   :  { %7 = vsyncpa [#allocation3], 0  ;;  %s1071_s0 = inlined_call_operand.hbm [shape: f32[2,256,256], index: 0, kind: input, shape index: {}]   ;;  %s1072_s1 = inlined_call_operand.hbm [shape: f32[2,4,256], index: 1, kind: input, shape index: {}]   ;;  %s1073_s2 = inlined_call_operand.hbm [shape: f32[2,4,256], index: 2, kind: output, shape index: {}]  }
   0x1   :  { %8 = vsyncpa [#allocation6], 0 }
   0x2   :  { %10 = vsyncpa [#allocation6 + $0x1], 0 }
   0x3   :  { %11 = vsyncpa [#allocation4], 0 }
   0x4   :  { %13 = vsyncpa [#allocation4 + $0x1], 0  ;;  %s911_s9 = smov 0   ;;  %s913_s10 = smov 0  }
   0x5   :  { %s915_s11 = smov 0   ;;  %s917_s12 = smov 0  }
   0x6 LB: > { %s108_s15 = sshll.u32 %s1071_s0, 4  ;;  %s935_s16 = sadd.s32 4294967295, %s890_s12   ;;  %s890_s12 = sphi %s917_s12, %s1083_s12   ;;  %s886_s11 = sphi %s915_s11, %s1082_s11   ;;  %s882_s10 = sphi %s913_s10, %s1081_s10   ;;  %s878_s9 = sphi %s911_s9, %s1080_s9   ;;  %s109_s15 = int_to_ptr.hbm [resolvable:$true] %s108_s15 }
   0x7   : > { %p671_p0 = scmp.ge.s32.totalorder %s890_s12, 1  ;;  %p61_p1 = scmp.eq.s32.totalorder %s935_s16, 0 }
   0x8   : > { %p97_p2 = scmp.lt.s32.totalorder %s890_s12, 3  ;;  %s892_s18 = smov [#allocation2]  }
   0x9   : > { %s110_s19 = sshll.u32 %s892_s18, 4  ;;  %s893_s20 = smov 256   ;;  %s111_s19 = int_to_ptr.vmem [resolvable:$true] %s110_s19 }
   0xa   : > { %p940_p3 = pnand %p671_p0, %p97_p2  ;;  %s894_s21 = smov 16  }
   0xb   : > { %s670_s22 = sadd.s32 4294967294, %s890_s12   ;;  %s951_s23 = sadd.s32 1, %s890_s12  }
   0xc   : > { %p698_p4 = pneg %p940_p3  ;;  %s47_s24 = sadd.s32 1, %s886_s11 }
   0xd   : > { %s44_s25 = ssub.s32 %s890_s12, %s951_s23  ;;  %p54_p7 = scmp.ne.s32.totalorder %s886_s11, %s882_s10 }
   0xe   : > { %p699_p6 = pnand %p698_p4, %p61_p1  ;;  %p45_p8 = scmp.eq.s32.totalorder %s44_s25, 0 }
   0xf   : > { %p55_p9 = scmp.eq.s32.totalorder %s890_s12, 0  ;;  %p60_p10 = scmp.ne.s32.totalorder %s882_s10, %s878_s9 }
  0x10   : > { %701 = dma.hbm_to_vmem [thread:$0]  (!%p699_p6), %s109_s15, 16384, %s111_s19, [#allocation3], %s893_s20, %s893_s20, %s894_s21  }
  0x11   : > { %p84_p11 = scmp.eq.s32.totalorder %s935_s16, 1  ;;  %p967_p12 = por %p61_p1, %p60_p10 }
  0x12   : > { %s963_s26 = scalar_select %p45_p8, %s886_s11, %s47_s24  }
  0x13   : > { %p971_p13 = por %p84_p11, %p54_p7  ;;  %p90_p0 = scmp.eq.s32.totalorder %s670_s22, 1 }
  0x14   : > { %p56_p2 = por %p55_p9, %p54_p7  ;;  %s124_s29 = sand.u32 1, %s886_s11  }
  0x15   : > { %p976_p4 = por %p90_p0, %p60_p10  ;;  %p711_p6 = scmp.lt.s32.totalorder %s890_s12, 2 }
  0x16   : > { %s674_s3 = sshll.u32 %s124_s29, 3  ;;  %s688_s4 = sshll.u32 %s890_s12, 3 }
  0x17   : > { %s133_s7 = scalar_lea.hbm %s1072_s1, %s688_s4  ;;  %s128_s13 = scalar_lea.vmem [#allocation5], %s674_s3 }
  0x18   : > { %s135_s8 = sshll.u32 %s133_s7, 4  ;;  %s137_s14 = sshll.u32 %s128_s13, 4  ;;  %s136_s8 = int_to_ptr.hbm [resolvable:$true] %s135_s8  ;;  %s138_s14 = int_to_ptr.vmem [resolvable:$true] %s137_s14 }
  0x19   : > { %p985_p8 = pnand %p711_p6, %p56_p2  ;;  %s125_s18 = scalar_lea.sflag [#allocation6], %s124_s29 }
  0x1a   : > { %s790_s19 = sshra.s32 %s136_s8, 4  ;;  %s797_s24 = scalar_lea.hbm %s1072_s1, 16  ;;  %s791_s19 = int_to_ptr.hbm [resolvable:$true] %s790_s19 }
  0x1b   : > { %s792_s20 = scalar_lea.hbm %s791_s19, 8  ;;  %p794_p9 = pneg %p985_p8 }
  0x1c   : > { %p793_p7 = scmp.ne.s32.totalorder %s791_s19, %s792_s20  ;;  %p798_p0 = scmp.lt.s32.totalorder %s791_s19, %s1072_s1 }
  0x1d   : > { %p799_p2 = scmp.lt.s32.totalorder %s797_s24, %s792_s20 }
  0x1e   : > { %p795_p10 = pnand %p794_p9, %p793_p7 }
  0x1f   : > { %p800_p6 = por %p799_p2, %p798_p0 }
  0x20   : > { %p796_p11 = pneg %p795_p10 }
  0x22   : > { %p801_p5 = pnand %p800_p6, %p796_p11 }
  0x24   : > { %804 = shalt.err (!%p801_p5)
}
  0x25   : > { %705 = dma.hbm_to_vmem [thread:$0]  (!%p985_p8), %s136_s8, 128, %s138_s14, %s125_s18  }
  0x26   : > { %146 = sbr.rel (%p940_p3) target bundleno = 296 (0x128), region = 28 }
  0x2b   : > { %865 = dma.done.wait (%p61_p1), [#allocation3], 16384  }
  0x2c   : > { %867 = vsyncadd (%p61_p1), [#allocation3], 4294950912  ;;  %s1006_s29 = sand.u32 1, %s882_s10  }
  0x2d   : > { %s679_s4 = sshll.u32 %s1006_s29, 3  ;;  %s154_s5 = scalar_lea.sflag [#allocation6], %s1006_s29 }
  0x2e   : > { %s1012_s6 = scalar_lea.vmem [#allocation5], %s679_s4 }
  0x2f   : > { %869 = dma.done.wait (%p967_p12), %s154_s5, 128  }
  0x30   : > { %871 = vsyncadd (%p967_p12), %s154_s5, 4294967168  ;;  %v324_v0 = vld [vmem:[#allocation2 + $0x2f0] sm:$0xff]  ;;  %v325_v1 = vld [vmem:[#allocation2 + $0x2f8] sm:$0xff]  ;;  %vm186_vm0 = vcmask 1043456   ;;  %s689_s17 = sshll.u32 %s935_s16, 3  ;;  %s178_s13 = scalar_lea.vmem [#allocation7], %s679_s4 }
  0x31   : > { %v322_v2 = vld [vmem:[#allocation2 + $0x2e0] sm:$0xff]  ;;  %358 = vmatpush.msra.mxu0 %v324_v0  ;;  %398 = vmatpush.msra.mxu2 %v325_v1  ;;  %v356_v3 = vld [vmem:[#allocation2 + $0x3f0] sm:$0xff]  ;;  %v323_v4 = vld [vmem:[#allocation2 + $0x2e8] sm:$0xff]  ;;  %s583_s8 = scalar_lea.hbm %s1073_s2, %s689_s17  ;;  %s585_s16 = sshll.u32 %s178_s13, 4  ;;  %s586_s16 = int_to_ptr.vmem [resolvable:$true] %s585_s16 }
  0x32   : > { %v357_v5 = vld [vmem:[#allocation2 + $0x3f8] sm:$0xff]  ;;  %378 = vmatpush.msra.mxu1 %v356_v3  ;;  %v320_v6 = vld [vmem:[#allocation2 + $0x2d0] sm:$0xff]  ;;  %v354_v7 = vld [vmem:[#allocation2 + $0x3e0] sm:$0xff]  ;;  %s587_s14 = sshll.u32 %s583_s8, 4  ;;  %s572_s15 = scalar_lea.sflag [#allocation4], %s1006_s29  ;;  %s588_s14 = int_to_ptr.hbm [resolvable:$true] %s587_s14 }
  0x33   : > { %418 = vmatpush.msra.mxu3 %v357_v5  ;;  %v321_v8 = vld [vmem:[#allocation2 + $0x2d8] sm:$0xff]  ;;  %359 = vmatpush.msra.mxu0 %v322_v2  ;;  %v355_v9 = vld [vmem:[#allocation2 + $0x3e8] sm:$0xff]  ;;  %v352_v10 = vld [vmem:[#allocation2 + $0x3d0] sm:$0xff]  ;;  %s834_s18 = sshra.s32 %s588_s14, 4  ;;  %s840_s22 = scalar_lea.hbm %s1073_s2, 16  ;;  %s835_s18 = int_to_ptr.hbm [resolvable:$true] %s834_s18 }
  0x34   : > { %399 = vmatpush.msra.mxu2 %v323_v4  ;;  %379 = vmatpush.msra.mxu1 %v354_v7  ;;  %v318_v11 = vld [vmem:[#allocation2 + $0x2c0] sm:$0xff]  ;;  %v319_v12 = vld [vmem:[#allocation2 + $0x2c8] sm:$0xff]  ;;  %v353_v13 = vld [vmem:[#allocation2 + $0x3d8] sm:$0xff]  ;;  %s836_s19 = scalar_lea.hbm %s835_s18, 8  ;;  %p841_p12 = scmp.lt.s32.totalorder %s835_s18, %s1073_s2 }
  0x35   : > { %419 = vmatpush.msra.mxu3 %v355_v9  ;;  %360 = vmatpush.msra.mxu0 %v320_v6  ;;  %v350_v14 = vld [vmem:[#allocation2 + $0x3c0] sm:$0xff]  ;;  %v351_v15 = vld [vmem:[#allocation2 + $0x3c8] sm:$0xff]  ;;  %v316_v16 = vld [vmem:[#allocation2 + $0x2b0] sm:$0xff]  ;;  %p837_p1 = scmp.ne.s32.totalorder %s835_s18, %s836_s19  ;;  %p842_p8 = scmp.lt.s32.totalorder %s840_s22, %s836_s19 }
  0x36   : > { %400 = vmatpush.msra.mxu2 %v321_v8  ;;  %380 = vmatpush.msra.mxu1 %v352_v10  ;;  %v317_v17 = vld [vmem:[#allocation2 + $0x2b8] sm:$0xff]  ;;  %v348_v18 = vld [vmem:[#allocation2 + $0x3b0] sm:$0xff]  ;;  %v314_v20 = vld [vmem:[#allocation2 + $0x2a0] sm:$0xff] }
  0x37   : > { %420 = vmatpush.msra.mxu3 %v353_v13  ;;  %361 = vmatpush.msra.mxu0 %v318_v11  ;;  %v349_v19 = vld [vmem:[#allocation2 + $0x3b8] sm:$0xff]  ;;  %v315_v21 = vld [vmem:[#allocation2 + $0x2a8] sm:$0xff]  ;;  %v346_v22 = vld [vmem:[#allocation2 + $0x3a0] sm:$0xff]  ;;  %p838_p3 = pnand %p837_p1, %p971_p13  ;;  %p843_p7 = por %p842_p8, %p841_p12 }
  0x38   : > { %401 = vmatpush.msra.mxu2 %v319_v12  ;;  %381 = vmatpush.msra.mxu1 %v350_v14  ;;  %v347_v23 = vld [vmem:[#allocation2 + $0x3a8] sm:$0xff]  ;;  %v312_v24 = vld [vmem:[#allocation2 + $0x290] sm:$0xff]  ;;  %v313_v25 = vld [vmem:[#allocation2 + $0x298] sm:$0xff] }
  0x39   : > { %421 = vmatpush.msra.mxu3 %v351_v15  ;;  %362 = vmatpush.msra.mxu0 %v316_v16  ;;  %v344_v26 = vld [vmem:[#allocation2 + $0x390] sm:$0xff]  ;;  %v345_v27 = vld [vmem:[#allocation2 + $0x398] sm:$0xff]  ;;  %v310_v28 = vld [vmem:[#allocation2 + $0x280] sm:$0xff]  ;;  %p839_p5 = pneg %p838_p3 }
  0x3a   : > { %402 = vmatpush.msra.mxu2 %v317_v17  ;;  %382 = vmatpush.msra.mxu1 %v348_v18  ;;  %v311_v29 = vld [vmem:[#allocation2 + $0x288] sm:$0xff]  ;;  %v342_v30 = vld [vmem:[#allocation2 + $0x380] sm:$0xff]  ;;  %v308_v32 = vld [vmem:[#allocation2 + $0x270] sm:$0xff] }
  0x3b   : > { %422 = vmatpush.msra.mxu3 %v349_v19  ;;  %363 = vmatpush.msra.mxu0 %v314_v20  ;;  %v343_v31 = vld [vmem:[#allocation2 + $0x388] sm:$0xff]  ;;  %v309_v33 = vld [vmem:[#allocation2 + $0x278] sm:$0xff]  ;;  %v340_v34 = vld [vmem:[#allocation2 + $0x370] sm:$0xff]  ;;  %p844_p9 = pnand %p843_p7, %p839_p5 }
  0x3c   : > { %403 = vmatpush.msra.mxu2 %v315_v21  ;;  %383 = vmatpush.msra.mxu1 %v346_v22  ;;  %v341_v35 = vld [vmem:[#allocation2 + $0x378] sm:$0xff]  ;;  %v306_v36 = vld [vmem:[#allocation2 + $0x260] sm:$0xff]  ;;  %v307_v37 = vld [vmem:[#allocation2 + $0x268] sm:$0xff] }
  0x3d   : > { %423 = vmatpush.msra.mxu3 %v347_v23  ;;  %364 = vmatpush.msra.mxu0 %v312_v24  ;;  %v338_v38 = vld [vmem:[#allocation2 + $0x360] sm:$0xff]  ;;  %v339_v39 = vld [vmem:[#allocation2 + $0x368] sm:$0xff]  ;;  %v304_v40 = vld [vmem:[#allocation2 + $0x250] sm:$0xff] }
  0x3e   : > { %404 = vmatpush.msra.mxu2 %v313_v25  ;;  %384 = vmatpush.msra.mxu1 %v344_v26  ;;  %v305_v41 = vld [vmem:[#allocation2 + $0x258] sm:$0xff]  ;;  %v336_v42 = vld [vmem:[#allocation2 + $0x350] sm:$0xff]  ;;  %v302_v44 = vld [vmem:[#allocation2 + $0x240] sm:$0xff] }
  0x3f   : > { %424 = vmatpush.msra.mxu3 %v345_v27  ;;  %365 = vmatpush.msra.mxu0 %v310_v28  ;;  %v337_v43 = vld [vmem:[#allocation2 + $0x358] sm:$0xff]  ;;  %v303_v45 = vld [vmem:[#allocation2 + $0x248] sm:$0xff]  ;;  %v334_v46 = vld [vmem:[#allocation2 + $0x340] sm:$0xff]  ;;  %v895_v28 = vmov 4.0  }
  0x40   : > { %405 = vmatpush.msra.mxu2 %v311_v29  ;;  %385 = vmatpush.msra.mxu1 %v342_v30  ;;  %v335_v47 = vld [vmem:[#allocation2 + $0x348] sm:$0xff]  ;;  %v300_v48 = vld [vmem:[#allocation2 + $0x230] sm:$0xff]  ;;  %v301_v49 = vld [vmem:[#allocation2 + $0x238] sm:$0xff]  ;;  %750 = vrcp.f32 %v895_v28 }
  0x41   : > { %425 = vmatpush.msra.mxu3 %v343_v31  ;;  %366 = vmatpush.msra.mxu0 %v308_v32  ;;  %v332_v50 = vld [vmem:[#allocation2 + $0x330] sm:$0xff]  ;;  %v333_v51 = vld [vmem:[#allocation2 + $0x338] sm:$0xff]  ;;  %v298_v52 = vld [vmem:[#allocation2 + $0x220] sm:$0xff] }
  0x42   : > { %406 = vmatpush.msra.mxu2 %v309_v33  ;;  %386 = vmatpush.msra.mxu1 %v340_v34  ;;  %v299_v53 = vld [vmem:[#allocation2 + $0x228] sm:$0xff]  ;;  %v330_v54 = vld [vmem:[#allocation2 + $0x320] sm:$0xff]  ;;  %v296_v56 = vld [vmem:[#allocation2 + $0x210] sm:$0xff] }
  0x43   : > { %426 = vmatpush.msra.mxu3 %v341_v35  ;;  %367 = vmatpush.msra.mxu0 %v306_v36  ;;  %v331_v55 = vld [vmem:[#allocation2 + $0x328] sm:$0xff]  ;;  %v297_v57 = vld [vmem:[#allocation2 + $0x218] sm:$0xff]  ;;  %v328_v58 = vld [vmem:[#allocation2 + $0x310] sm:$0xff] }
  0x44   : > { %407 = vmatpush.msra.mxu2 %v307_v37  ;;  %387 = vmatpush.msra.mxu1 %v338_v38  ;;  %v329_v59 = vld [vmem:[#allocation2 + $0x318] sm:$0xff]  ;;  %v294_v60 = vld [vmem:[#allocation2 + $0x200] sm:$0xff]  ;;  %v295_v61 = vld [vmem:[#allocation2 + $0x208] sm:$0xff] }
  0x45   : > { %427 = vmatpush.msra.mxu3 %v339_v39  ;;  %368 = vmatpush.msra.mxu0 %v304_v40  ;;  %v259_v62 = vld [vmem:[#allocation2 + $0xf0] sm:$0xff]  ;;  %v260_v63 = vld [vmem:[#allocation2 + $0xf8] sm:$0xff]  ;;  %v326_v0 = vld [vmem:[#allocation2 + $0x300] sm:$0xff] }
  0x46   : > { %408 = vmatpush.msra.mxu2 %v305_v41  ;;  %388 = vmatpush.msra.mxu1 %v336_v42  ;;  %v327_v1 = vld [vmem:[#allocation2 + $0x308] sm:$0xff]  ;;  %v257_v2 = vld [vmem:[#allocation2 + $0xe0] sm:$0xff]  ;;  %v291_v3 = vld [vmem:[#allocation2 + $0x1f0] sm:$0xff] }
  0x47   : > { %428 = vmatpush.msra.mxu3 %v337_v43  ;;  %369 = vmatpush.msra.mxu0 %v302_v44  ;;  %v258_v4 = vld [vmem:[#allocation2 + $0xe8] sm:$0xff]  ;;  %v292_v5 = vld [vmem:[#allocation2 + $0x1f8] sm:$0xff]  ;;  %v255_v6 = vld [vmem:[#allocation2 + $0xd0] sm:$0xff]  ;;  %v1025_v44 = vpop.eup %750 }
  0x48   : > { %409 = vmatpush.msra.mxu2 %v303_v45  ;;  %389 = vmatpush.msra.mxu1 %v334_v46  ;;  %v289_v7 = vld [vmem:[#allocation2 + $0x1e0] sm:$0xff]  ;;  %v256_v8 = vld [vmem:[#allocation2 + $0xd8] sm:$0xff]  ;;  %v290_v9 = vld [vmem:[#allocation2 + $0x1e8] sm:$0xff]  ;;  %vm206_vm1 = vweird.f32 %v1025_v44 }
  0x49   : > { %429 = vmatpush.msra.mxu3 %v335_v47  ;;  %370 = vmatpush.msra.mxu0 %v300_v48  ;;  %v253_v10 = vld [vmem:[#allocation2 + $0xc0] sm:$0xff]  ;;  %v287_v11 = vld [vmem:[#allocation2 + $0x1d0] sm:$0xff]  ;;  %v254_v12 = vld [vmem:[#allocation2 + $0xc8] sm:$0xff] }
  0x4a   : > { %410 = vmatpush.msra.mxu2 %v301_v49  ;;  %390 = vmatpush.msra.mxu1 %v332_v50  ;;  %v288_v13 = vld [vmem:[#allocation2 + $0x1d8] sm:$0xff]  ;;  %v1019_v14 = vld [vmem:[%s1012_s6] sm:$0xff]  ;;  %v251_v15 = vld [vmem:[#allocation2 + $0xb0] sm:$0xff] }
  0x4b   : > { %430 = vmatpush.msra.mxu3 %v333_v51  ;;  %371 = vmatpush.msra.mxu0 %v298_v52  ;;  %v285_v16 = vld [vmem:[#allocation2 + $0x1c0] sm:$0xff]  ;;  %181 = vst [vmem:[#allocation1] ss:$2 sm:$0xff] %v1019_v14  ;;  %v252_v17 = vld [vmem:[#allocation2 + $0xb8] sm:$0xff]  ;;  %v286_v18 = vld [vmem:[#allocation2 + $0x1c8] sm:$0xff] }
  0x4c   : > { %411 = vmatpush.msra.mxu2 %v299_v53  ;;  %391 = vmatpush.msra.mxu1 %v330_v54  ;;  %v249_v19 = vld [vmem:[#allocation2 + $0xa0] sm:$0xff]  ;;  %v283_v20 = vld [vmem:[#allocation2 + $0x1b0] sm:$0xff]  ;;  %v250_v21 = vld [vmem:[#allocation2 + $0xa8] sm:$0xff] }
  0x4d   : > { %431 = vmatpush.msra.mxu3 %v331_v55  ;;  %372 = vmatpush.msra.mxu0 %v296_v56  ;;  %v284_v22 = vld [vmem:[#allocation2 + $0x1b8] sm:$0xff]  ;;  %v247_v23 = vld [vmem:[#allocation2 + $0x90] sm:$0xff]  ;;  %v281_v24 = vld [vmem:[#allocation2 + $0x1a0] sm:$0xff]  ;;  %v202_v56 = vmul.f32 4.0, %v1025_v44 }
  0x4e   : > { %412 = vmatpush.msra.mxu2 %v297_v57  ;;  %392 = vmatpush.msra.mxu1 %v328_v58  ;;  %v248_v25 = vld [vmem:[#allocation2 + $0x98] sm:$0xff]  ;;  %v282_v26 = vld [vmem:[#allocation2 + $0x1a8] sm:$0xff]  ;;  %v245_v27 = vld [vmem:[#allocation2 + $0x80] sm:$0xff] }
  0x4f   : > { %432 = vmatpush.msra.mxu3 %v329_v59  ;;  %373 = vmatpush.msra.mxu0 %v294_v60  ;;  %v279_v29 = vld [vmem:[#allocation2 + $0x190] sm:$0xff]  ;;  %v246_v30 = vld [vmem:[#allocation2 + $0x88] sm:$0xff]  ;;  %v280_v31 = vld [vmem:[#allocation2 + $0x198] sm:$0xff] }
  0x50   : > { %413 = vmatpush.msra.mxu2 %v295_v61  ;;  %393 = vmatpush.msra.mxu1 %v326_v0  ;;  %v243_v34 = vld [vmem:[#allocation2 + $0x70] sm:$0xff]  ;;  %v277_v35 = vld [vmem:[#allocation2 + $0x180] sm:$0xff]  ;;  %v244_v38 = vld [vmem:[#allocation2 + $0x78] sm:$0xff] }
  0x51   : > { %438 = vmatpush.msrb.mxu0 %v259_v62  ;;  %433 = vmatpush.msra.mxu3 %v327_v1  ;;  %v278_v39 = vld [vmem:[#allocation2 + $0x188] sm:$0xff]  ;;  %v241_v41 = vld [vmem:[#allocation2 + $0x60] sm:$0xff]  ;;  %v275_v42 = vld [vmem:[#allocation2 + $0x170] sm:$0xff] }
  0x52   : > { %478 = vmatpush.msrb.mxu2 %v260_v63  ;;  %458 = vmatpush.msrb.mxu1 %v291_v3  ;;  %v182_v32 = vld.sshfl [vmem:[#allocation1] sm:$0xff pattern:$0x75316420]  ;;  %v183_v33 = vld.sshfl [vmem:[#allocation1 + $0x8] sm:$0xff pattern:$0x75316420] }
  0x53   : > { %439 = vmatpush.msrb.mxu0 %v257_v2  ;;  %498 = vmatpush.msrb.mxu3 %v292_v5  ;;  %210 = vst [vmem:[#allocation1] ss:$2 sm:$0xff] %v1019_v14  ;;  %v187_v36 = vsel %vm186_vm0, %v182_v32, 0.0  ;;  %v194_v37 = vsel %vm186_vm0, %v183_v33, 0.0  ;;  %v242_v45 = vld [vmem:[#allocation2 + $0x68] sm:$0xff]  ;;  %v276_v46 = vld [vmem:[#allocation2 + $0x178] sm:$0xff] }
  0x54   : > { %479 = vmatpush.msrb.mxu2 %v258_v4  ;;  %459 = vmatpush.msrb.mxu1 %v289_v7  ;;  %v188_v40 = vrot.slane %v187_v36, 4  ;;  %v195_v43 = vrot.slane %v194_v37, 4  ;;  %v239_v47 = vld [vmem:[#allocation2 + $0x50] sm:$0xff]  ;;  %v273_v48 = vld [vmem:[#allocation2 + $0x160] sm:$0xff]  ;;  %v240_v49 = vld [vmem:[#allocation2 + $0x58] sm:$0xff]  ;;  %v203_v7 = vsub.f32 1.0, %v202_v56 }
  0x55   : > { %440 = vmatpush.msrb.mxu0 %v255_v6  ;;  %499 = vmatpush.msrb.mxu3 %v290_v9  ;;  %v274_v50 = vld [vmem:[#allocation2 + $0x168] sm:$0xff]  ;;  %v237_v51 = vld [vmem:[#allocation2 + $0x40] sm:$0xff]  ;;  %v271_v53 = vld [vmem:[#allocation2 + $0x150] sm:$0xff] }
  0x56   : > { %480 = vmatpush.msrb.mxu2 %v256_v8  ;;  %460 = vmatpush.msrb.mxu1 %v287_v11  ;;  %v189_v52 = vadd.f32 %v188_v40, %v187_v36  ;;  %v238_v54 = vld [vmem:[#allocation2 + $0x48] sm:$0xff]  ;;  %v272_v55 = vld [vmem:[#allocation2 + $0x158] sm:$0xff]  ;;  %v196_v57 = vadd.f32 %v195_v43, %v194_v37  ;;  %v235_v62 = vld [vmem:[#allocation2 + $0x30] sm:$0xff] }
  0x57   : > { %441 = vmatpush.msrb.mxu0 %v253_v10  ;;  %500 = vmatpush.msrb.mxu3 %v288_v13  ;;  %v269_v63 = vld [vmem:[#allocation2 + $0x140] sm:$0xff]  ;;  %v236_v2 = vld [vmem:[#allocation2 + $0x38] sm:$0xff]  ;;  %v270_v3 = vld [vmem:[#allocation2 + $0x148] sm:$0xff] }
  0x58   : > { %481 = vmatpush.msrb.mxu2 %v254_v12  ;;  %461 = vmatpush.msrb.mxu1 %v285_v16  ;;  %v190_v4 = vrot.slane %v189_v52, 2  ;;  %v233_v5 = vld [vmem:[#allocation2 + $0x20] sm:$0xff]  ;;  %v267_v6 = vld [vmem:[#allocation2 + $0x130] sm:$0xff]  ;;  %v197_v8 = vrot.slane %v196_v57, 2  ;;  %v234_v11 = vld [vmem:[#allocation2 + $0x28] sm:$0xff] }
  0x59   : > { %442 = vmatpush.msrb.mxu0 %v251_v15  ;;  %501 = vmatpush.msrb.mxu3 %v286_v18  ;;  %v268_v12 = vld [vmem:[#allocation2 + $0x138] sm:$0xff]  ;;  %v231_v13 = vld [vmem:[#allocation2 + $0x10] sm:$0xff]  ;;  %v266_v18 = vld [vmem:[#allocation2 + $0x128] sm:$0xff] }
  0x5a   : > { %482 = vmatpush.msrb.mxu2 %v252_v17  ;;  %462 = vmatpush.msrb.mxu1 %v283_v20  ;;  %v211_v58 = vld.sshfl [vmem:[#allocation1] sm:$0xff pattern:$0x75316420]  ;;  %v212_v59 = vld.sshfl [vmem:[#allocation1 + $0x8] sm:$0xff pattern:$0x75316420] }
  0x5b   : > { %443 = vmatpush.msrb.mxu0 %v249_v19  ;;  %502 = vmatpush.msrb.mxu3 %v284_v22  ;;  %v215_v60 = vsel %vm186_vm0, %v211_v58, -inf  ;;  %v222_v61 = vsel %vm186_vm0, %v212_v59, -inf  ;;  %558 = vst [vmem:[#allocation1] ss:$2 sm:$0xff] %v1019_v14  ;;  %v265_v14 = vld [vmem:[#allocation2 + $0x120] sm:$0xff]  ;;  %v232_v17 = vld [vmem:[#allocation2 + $0x18] sm:$0xff]  ;;  %v191_v19 = vadd.f32 %v190_v4, %v189_v52  ;;  %v204_v22 = vmul.f32 %v1025_v44, %v203_v7 }
  0x5c   : > { %483 = vmatpush.msrb.mxu2 %v250_v21  ;;  %463 = vmatpush.msrb.mxu1 %v281_v24  ;;  %v216_v0 = vrot.slane %v215_v60, 4  ;;  %v223_v1 = vrot.slane %v222_v61, 4  ;;  %v229_v20 = vld [vmem:[#allocation2] sm:$0xff]  ;;  %v263_v21 = vld [vmem:[#allocation2 + $0x110] sm:$0xff]  ;;  %v262_v32 = vld [vmem:[#allocation2 + $0x108] sm:$0xff] }
  0x5d   : > { %444 = vmatpush.msrb.mxu0 %v247_v23  ;;  %503 = vmatpush.msrb.mxu3 %v282_v26  ;;  %v198_v23 = vadd.f32 %v197_v8, %v196_v57  ;;  %v230_v26 = vld [vmem:[#allocation2 + $0x8] sm:$0xff]  ;;  %v261_v28 = vld [vmem:[#allocation2 + $0x100] sm:$0xff]  ;;  %v205_v33 = vadd.f32 %v1025_v44, %v204_v22 }
  0x5e   : > { %484 = vmatpush.msrb.mxu2 %v248_v25  ;;  %464 = vmatpush.msrb.mxu1 %v279_v29  ;;  %v217_v9 = vmax.f32 %v215_v60, %v216_v0  ;;  %v224_v10 = vmax.f32 %v222_v61, %v223_v1 }
  0x5f   : > { %445 = vmatpush.msrb.mxu0 %v245_v27  ;;  %504 = vmatpush.msrb.mxu3 %v280_v31  ;;  %v264_v27 = vld [vmem:[#allocation2 + $0x118] sm:$0xff]  ;;  %v192_v31 = vrot.slane %v191_v19, 1 }
  0x60   : > { %485 = vmatpush.msrb.mxu2 %v246_v30  ;;  %465 = vmatpush.msrb.mxu1 %v277_v35  ;;  %v218_v15 = vrot.slane %v217_v9, 2  ;;  %v225_v16 = vrot.slane %v224_v10, 2 }
  0x61   : > { %446 = vmatpush.msrb.mxu0 %v243_v34  ;;  %505 = vmatpush.msrb.mxu3 %v278_v39  ;;  %v199_v34 = vrot.slane %v198_v23, 1  ;;  %v193_v37 = vadd.f32 %v192_v31, %v191_v19 }
  0x62   : > { %486 = vmatpush.msrb.mxu2 %v244_v38  ;;  %466 = vmatpush.msrb.mxu1 %v275_v42  ;;  %v219_v24 = vmax.f32 %v217_v9, %v218_v15  ;;  %v226_v25 = vmax.f32 %v224_v10, %v225_v16  ;;  %v207_v38 = vsel %vm206_vm1, %v1025_v44, %v205_v33 }
  0x63   : > { %447 = vmatpush.msrb.mxu0 %v241_v41  ;;  %506 = vmatpush.msrb.mxu3 %v276_v46  ;;  %v200_v39 = vadd.f32 %v199_v34, %v198_v23  ;;  %v208_v40 = vmul.f32 %v207_v38, %v193_v37 }
  0x64   : > { %487 = vmatpush.msrb.mxu2 %v242_v45  ;;  %467 = vmatpush.msrb.mxu1 %v273_v48  ;;  %v220_v29 = vrot.slane %v219_v24, 1  ;;  %v227_v30 = vrot.slane %v226_v25, 1 }
  0x65   : > { %448 = vmatpush.msrb.mxu0 %v239_v47  ;;  %507 = vmatpush.msrb.mxu3 %v274_v50  ;;  %v209_v41 = vmul.f32 %v207_v38, %v200_v39 }
  0x66   : > { %488 = vmatpush.msrb.mxu2 %v240_v49  ;;  %468 = vmatpush.msrb.mxu1 %v271_v53  ;;  %v221_v35 = vmax.f32 %v219_v24, %v220_v29  ;;  %v228_v36 = vmax.f32 %v226_v25, %v227_v30 }
  0x67   : > { %449 = vmatpush.msrb.mxu0 %v237_v51  ;;  %508 = vmatpush.msrb.mxu3 %v272_v55 }
  0x68   : > { %489 = vmatpush.msrb.mxu2 %v238_v54  ;;  %469 = vmatpush.msrb.mxu1 %v269_v63 }
  0x69   : > { %450 = vmatpush.msrb.mxu0 %v235_v62  ;;  %509 = vmatpush.msrb.mxu3 %v270_v3 }
  0x6a   : > { %490 = vmatpush.msrb.mxu2 %v236_v2  ;;  %470 = vmatpush.msrb.mxu1 %v267_v6 }
  0x6b   : > { %451 = vmatpush.msrb.mxu0 %v233_v5  ;;  %510 = vmatpush.msrb.mxu3 %v268_v12 }
  0x6c   : > { %491 = vmatpush.msrb.mxu2 %v234_v11  ;;  %471 = vmatpush.msrb.mxu1 %v265_v14 }
  0x6d   : > { %452 = vmatpush.msrb.mxu0 %v231_v13  ;;  %511 = vmatpush.msrb.mxu3 %v266_v18  ;;  %v560_v18 = vld.sshfl [vmem:[#allocation1 + $0x8] sm:$0xff pattern:$0x75316420] }
  0x6e   : > { %492 = vmatpush.msrb.mxu2 %v232_v17  ;;  %472 = vmatpush.msrb.mxu1 %v263_v21  ;;  %v559_v21 = vld.sshfl [vmem:[#allocation1] sm:$0xff pattern:$0x75316420] }
  0x6f   : > { %453 = vmatpush.msrb.mxu0 %v229_v20  ;;  %512 = vmatpush.msrb.mxu3 %v264_v27 }
  0x70   : > { %493 = vmatpush.msrb.mxu2 %v230_v26  ;;  %473 = vmatpush.msrb.mxu1 %v261_v28 }
  0x71   : > { %513 = vmatpush.msrb.mxu3 %v262_v32  ;;  %374 = vmatmul.f32.vlgmr.msra.gmra.mxu0 %v221_v35 }
  0x72   : > { %414 = vmatmul.f32.vlgmr.msra.gmra.mxu2 %v221_v35  ;;  %434 = vmatmul.f32.vlgmr.msra.gmra.mxu3 %v228_v36 }
  0x73   : > { %394 = vmatmul.f32.vlgmr.msra.gmra.mxu1 %v228_v36 }
  0x79   : > { %454 = vmatmul.f32.vlgmr.msrb.gmra.mxu0 %v208_v40 }
  0x7a   : > { %494 = vmatmul.f32.vlgmr.msrb.gmra.mxu2 %v208_v40  ;;  %514 = vmatmul.f32.vlgmr.msrb.gmra.mxu3 %v209_v41 }
  0x7b   : > { %474 = vmatmul.f32.vlgmr.msrb.gmra.mxu1 %v209_v41 }
  0xee   : > { %v375_v42 = vpop.f32.mrf.mxu0 }
  0xf0   : > { %v395_v43 = vpop.f32.mrf.mxu1 }
  0xf1   : > { %v396_v45 = vadd.f32 %v395_v43, %v375_v42 }
  0xf5   : > { %v415_v46 = vpop.f32.mrf.mxu2  ;;  %v435_v47 = vpop.f32.mrf.mxu3 }
  0xf6   : > { %v455_v48 = vpop.f32.mrf.mxu0  ;;  %v436_v52 = vadd.f32 %v435_v47, %v415_v46 }
  0xf7   : > { %v456_v49 = vadd.f32 %v455_v48, %v396_v45 }
  0xf8   : > { %v475_v50 = vpop.f32.mrf.mxu1 }
  0xf9   : > { %v476_v51 = vadd.f32 %v475_v50, %v456_v49 }
  0xfb   : > { %v681_v53 = vmul.f32 -1.442695, %v476_v51 }
  0xfd   : > { %v495_v54 = vpop.f32.mrf.mxu2  ;;  %752 = vpow2.f32 %v681_v53  ;;  %v515_v55 = vpop.f32.mrf.mxu3 }
  0xfe   : > { %v496_v44 = vadd.f32 %v495_v54, %v436_v52 }
 0x100   : > { %v516_v56 = vadd.f32 %v515_v55, %v496_v44 }
 0x102   : > { %v682_v57 = vmul.f32 -1.442695, %v516_v56 }
 0x103   : > { %v753_v58 = vpop.eup %752 }
 0x104   : > { %754 = vpow2.f32 %v682_v57  ;;  %v524_v59 = vadd.f32 1.0, %v753_v58 }
 0x106   : > { %756 = vrcp.f32 %v524_v59  ;;  %v537_v5 = vand.u32 2147483648, %v524_v59  ;;  %vm531_vm3 = vweird.f32 %v524_v59  ;;  %v535_v6 = vand.u32 2147483647, %v524_v59 }
 0x108   : > { %v538_v12 = vor.u32 1.1754944e-38, %v537_v5  ;;  %vm536_vm6 = vcmp.eq.f32.partialorder %v535_v6, 8.507059e+37 }
 0x10a   : > { %v755_v60 = vpop.eup %754 }
 0x10b   : > { %v525_v61 = vadd.f32 1.0, %v755_v60 }
 0x10c   : > { %v757_v62 = vpop.eup %756 }
 0x10d   : > { %758 = vrcp.f32 %v525_v61  ;;  %v527_v63 = vmul.f32 %v757_v62, %v524_v59  ;;  %vm532_vm2 = vweird.f32 %v757_v62  ;;  %v552_v8 = vand.u32 2147483648, %v525_v61 }
 0x10e   : > { %vm533_vm4 = vmor %vm531_vm3, %vm532_vm2  ;;  %v550_v10 = vand.u32 2147483647, %v525_v61  ;;  %vm546_vm7 = vweird.f32 %v525_v61 }
 0x10f   : > { %v528_v0 = vsub.f32 1.0, %v527_v63  ;;  %v553_v14 = vor.u32 1.1754944e-38, %v552_v8 }
 0x110   : > { %vm551_vm9 = vcmp.eq.f32.partialorder %v550_v10, 8.507059e+37 }
 0x111   : > { %v529_v1 = vmul.f32 %v757_v62, %v528_v0 }
 0x113   : > { %v759_v2 = vpop.eup %758  ;;  %v530_v3 = vadd.f32 %v757_v62, %v529_v1 }
 0x114   : > { %v542_v4 = vmul.f32 %v759_v2, %v525_v61  ;;  %vm547_vm5 = vweird.f32 %v759_v2 }
 0x115   : > { %v534_v11 = vsel %vm533_vm4, %v757_v62, %v530_v3  ;;  %vm548_vm8 = vmor %vm546_vm7, %vm547_vm5 }
 0x116   : > { %v543_v7 = vsub.f32 1.0, %v542_v4  ;;  %v539_v15 = vsel %vm536_vm6, %v538_v12, %v534_v11 }
 0x117   : > { %v556_v19 = vperm.slane %v539_v15, 0 }
 0x118   : > { %v544_v9 = vmul.f32 %v759_v2, %v543_v7 }
 0x119   : > { %v563_v23 = vmul.f32 %v559_v21, %v556_v19 }
 0x11a   : > { %v545_v13 = vadd.f32 %v759_v2, %v544_v9 }
 0x11c   : > { %v549_v16 = vsel %vm548_vm8, %v759_v2, %v545_v13 }
 0x11d   : > { %v554_v17 = vsel %vm551_vm9, %v553_v14, %v549_v16 }
 0x11e   : > { %v557_v20 = vperm.slane %v554_v17, 0 }
 0x120   : > { %v564_v22 = vmul.f32 %v560_v18, %v557_v20 }
 0x122   : > { %v567_v24 = vrot.slane %v564_v22, 4 }
 0x124   : > { %v568_v25 = vsel %vm186_vm0, %v563_v23, %v567_v24 }
 0x125   : > { %570 = vst [vmem:[%s178_s13] sm:$0xff] %v568_v25 }
 0x126   : > { %847 = shalt.err (!%p844_p9)
}
 0x127   : > { %696 = dma.vmem_to_hbm [thread:$0]  (%p971_p13), %s586_s16, 128, %s588_s14, %s572_s15  }
 0x128 PF: > { %s599_s3 = sand.u32 1, %s878_s9   ;;  %p1079_p10 = scmp.ge.s32.totalorder %s890_s12, 2 }
 0x129   : > { %s600_s29 = scalar_lea.sflag [#allocation4], %s599_s3 }
 0x12a   : > { %p707_p11 = pnand %p1079_p10, %p976_p4 }
 0x12c   : > { %p708_p0 = pneg %p707_p11 }
 0x12e   : > { %873 = dma.done.wait (%p708_p0), %s600_s29, 128  }
 0x12f   : > { %875 = vsyncadd (%p708_p0), %s600_s29, 4294967168  ;;  %p16_p2 = scmp.ge.s32.totalorder %s951_s23, 4   ;;  %s1080_s9 = smov %s882_s10 }
 0x130   : > { %s1081_s10 = smov %s886_s11  ;;  %s1082_s11 = smov %s963_s26 }
 0x131   : > { %s1083_s12 = smov %s951_s23  ;;  %18 = sbr.rel (!%p16_p2) target bundleno = 6 (0x6), region = 79 }
 0x136   :  { %606 = vsyncpa [#allocation3], 1 }
 0x137   :  { %608 = vsyncpa [#allocation3 + $0x1], 1 }
 0x138   :  { %609 = vsyncpa [#allocation6], 1 }
 0x139   :  { %611 = vsyncpa [#allocation6 + $0x1], 1 }
 0x13a   :  { %612 = vsyncpa [#allocation4], 1 }
 0x13b   :  { %614 = vsyncpa [#allocation4 + $0x1], 1 }

</bundles_post_ra>
